<compile_context>
chip_gen: v6e
topology: v6e:2x2x1
jax: 0.10.0
libtpu: 0.0.40
codegen_flags: <defaults>
</compile_context>

<pallas_src>
import functools

import jax
import jax.numpy as jnp
from jax.experimental import pallas as pl
from jax.experimental.pallas import tpu as pltpu

B = 2          # batch
S = 8          # question sequence length
T = 8          # decoder sequence length
E = 32         # encoder embedding dim
H = 32         # hidden dim (stand-in for retrieval_vector_size=1024)
V = 128        # generator vocab size (lane-aligned)
N_DOCS = 4     # retrieved docs per query (args.n_docs)
N_CORPUS = 16  # synthetic corpus size
ENC_VOCAB = 64
LANE = 128     # TPU lane width
BNT = B * N_DOCS * T

_VMEM = pl.BlockSpec(memory_space=pltpu.MemorySpace.VMEM)


# ----------------------------- Pallas kernels ------------------------------

def _encoder_pool_kernel(emb_ref, mask_ref, w_ref, out_ref):
    # emb: (B, S, E) f32, mask: (B, S, 1) f32, w: (E, LANE) bf16 (cols >= H are 0)
    # -> out: (B, LANE) f32 (lane-dense; caller slices [:, :H]).
    emb = emb_ref[...] * mask_ref[...]                       # mask broadcast in-kernel
    flat = emb.reshape(B * S, E).astype(jnp.bfloat16)        # bf16 MXU operand
    h = jnp.tanh(jnp.dot(flat, w_ref[...],
                         preferred_element_type=jnp.float32))  # (B*S, LANE)
    # spec: question_encoder(...)[0].mean(1)  (plain mean over sequence dim)
    out_ref[...] = jnp.mean(h.reshape(B, S, LANE), axis=1)


def encoder_pool(emb, mask, w_pad_bf16):
    return pl.pallas_call(
        _encoder_pool_kernel,
        out_shape=jax.ShapeDtypeStruct((B, LANE), jnp.float32),
        in_specs=[_VMEM, _VMEM, _VMEM],
        out_specs=_VMEM,
    )(emb, mask, w_pad_bf16)


def _rag_post_kernel(q_ref, r_ref, dec_ref, dmask_ref, ctx_w_ref, gen_w_ref,
                     lab_ref, logits_ref, ds_ref, loss_ref):
    # Fused post-retrieval path:
    #   q:     (B, H) f32           pooled question hidden states
    #   r:     (B, N_DOCS, H) f32   retrieved_doc_embeds
    #   dec:   (B, T, H) f32        decoder token embeddings
    #   dmask: (B, T, 1) f32        decoder attention mask
    #   ctx_w: (H, H) bf16          synthetic context projection
    #   gen_w: (H, V) bf16          generator output projection
    #   lab:   (BNT, 1) int32       shifted labels, repeat_interleave(n_docs)
    # outputs:
    #   logits: (BNT, V) f32, ds: (B, LANE) f32 (doc scores lane-padded),
    #   loss:   (1, LANE) f32 (scalar broadcast across lanes).
    q = q_ref[...]
    r = r_ref[...]

    # ---- doc_scores = bmm(q.unsqueeze(1), retrieved.transpose(1, 2)).squeeze(1)
    scores = jnp.sum(q[:, None, :] * r, axis=-1)             # (B, N_DOCS)
    # lane-pad (B, N_DOCS) -> (B, LANE) via a one-hot selector matmul so the
    # store is a full, unmasked lane write.
    sel = (jax.lax.broadcasted_iota(jnp.int32, (N_DOCS, LANE), 0) ==
           jax.lax.broadcasted_iota(jnp.int32, (N_DOCS, LANE), 1)
           ).astype(jnp.float32)
    ds_ref[...] = jnp.dot(scores, sel, preferred_element_type=jnp.float32)

    # ---- synthetic generator hidden state (repeat over docs done in-register)
    ctx = jnp.dot(r.reshape(B * N_DOCS, H).astype(jnp.bfloat16), ctx_w_ref[...],
                  preferred_element_type=jnp.float32)        # (B*N_DOCS, H)
    dec_m = dec_ref[...] * dmask_ref[...]                    # (B, T, H)
    rows = []
    for b in range(B):                                       # static unroll, B*N_DOCS tiles
        for n in range(N_DOCS):
            i = b * N_DOCS + n
            rows.append(jnp.tanh(dec_m[b] + ctx[i:i + 1, :]))  # (T, H)
    hidden = jnp.concatenate(rows, axis=0)                   # (BNT, H)

    # ---- generator logits on the MXU (bf16 operands, f32 accumulate)
    logits = jnp.dot(hidden.astype(jnp.bfloat16), gen_w_ref[...],
                     preferred_element_type=jnp.float32)     # (BNT, V)
    logits_ref[...] = logits

    # ---- mean cross-entropy, consumed straight from VMEM (no HBM round trip)
    lab = lab_ref[...]                                       # (BNT, 1) int32
    m = jnp.max(logits, axis=-1, keepdims=True)
    lse = m + jnp.log(jnp.sum(jnp.exp(logits - m), axis=-1, keepdims=True))
    vocab_ids = jax.lax.broadcasted_iota(jnp.int32, (BNT, V), 1)
    picked = jnp.sum(jnp.where(vocab_ids == lab, logits, 0.0),
                     axis=-1, keepdims=True)
    per_row = lse - picked                                   # (BNT, 1)
    loss = jnp.sum(per_row, axis=0, keepdims=True) * (1.0 / BNT)  # (1, 1)
    loss_ref[...] = jnp.broadcast_to(loss, (1, LANE))


def rag_post(q_hidden, retrieved, dec_emb, dmask, ctx_proj_bf16, gen_out_bf16,
             labels_col):
    logits, ds_pad, loss_row = pl.pallas_call(
        _rag_post_kernel,
        out_shape=(jax.ShapeDtypeStruct((BNT, V), jnp.float32),
                   jax.ShapeDtypeStruct((B, LANE), jnp.float32),
                   jax.ShapeDtypeStruct((1, LANE), jnp.float32)),
        in_specs=[_VMEM] * 7,
        out_specs=(_VMEM, _VMEM, _VMEM),
    )(q_hidden, retrieved, dec_emb, dmask, ctx_proj_bf16, gen_out_bf16,
      labels_col)
    return logits, ds_pad[:, :N_DOCS], loss_row[0, 0]


# ------------------------------- parameters --------------------------------

def init_params():
    k = jax.random.PRNGKey(42)
    k1, k2, k3, k4, k5, k6 = jax.random.split(k, 6)
    enc_w = jax.random.normal(k2, (E, H), jnp.float32) * 0.1
    # Zero-pad the encoder projection to LANE output columns so the pooled
    # hidden state is written with a full-lane store (tanh(0)=0 in pad cols).
    enc_w_pad = jnp.zeros((E, LANE), jnp.float32).at[:, :H].set(enc_w)
    return {
        "enc_embed":  jax.random.normal(k1, (ENC_VOCAB, E), jnp.float32) * 0.1,
        "enc_w_pad":  enc_w_pad.astype(jnp.bfloat16),          # bf16 MXU operand
        "doc_embeds": jax.random.normal(k3, (N_CORPUS, H), jnp.float32),
        "gen_embed":  jax.random.normal(k4, (V, H), jnp.float32) * 0.1,
        "ctx_proj":   (jax.random.normal(k5, (H, H), jnp.float32) * 0.1
                       ).astype(jnp.bfloat16),
        "gen_out":    (jax.random.normal(k6, (H, V), jnp.float32) * 0.1
                       ).astype(jnp.bfloat16),
    }


# ------------------------------ forward pass --------------------------------

def rag_forward(params, input_ids, labels, attention_mask,
                decoder_attention_mask):
    # 1) question encoder -> pooled question_hidden_states (B, H)   [Pallas #1]
    q_emb = params["enc_embed"][input_ids]                           # (B, S, E)
    mask = attention_mask.astype(jnp.float32)[..., None]             # (B, S, 1)
    q_hidden_pad = encoder_pool(q_emb, mask, params["enc_w_pad"])    # (B, 128)
    q_hidden = q_hidden_pad[:, :H]                                   # (B, H)

    # 2) retriever emulation: dense top-k over a fixed in-memory corpus
    # TODO(synk): real RagRetriever does FAISS index lookup + doc tokenization
    # (context_input_ids); no clean Pallas equivalent, emulated with argsort.
    sims = q_hidden @ params["doc_embeds"].T                         # (B, N_CORPUS)
    top_idx = jnp.argsort(-sims, axis=-1)[:, :N_DOCS]                # (B, n_docs)
    retrieved = params["doc_embeds"][top_idx]                        # (B, n_docs, H)

    # 3-5) doc_scores bmm + generator hidden/logits + mean CE, one fused kernel
    dec_emb = params["gen_embed"][labels]                            # (B, T, H)
    dmask = decoder_attention_mask.astype(jnp.float32)[..., None]    # (B, T, 1)
    shifted = jnp.concatenate(
        [labels[:, 1:], jnp.full((B, 1), 1, dtype=labels.dtype)], axis=1)
    labels_col = jnp.repeat(shifted, N_DOCS, axis=0).reshape(BNT, 1)
    labels_col = labels_col.astype(jnp.int32)

    logits_flat, doc_scores, loss = rag_post(                        # [Pallas #2]
        q_hidden, retrieved, dec_emb, dmask,
        params["ctx_proj"], params["gen_out"], labels_col)

    logits = logits_flat.reshape(B * N_DOCS, T, V)
    return {"logits": logits, "doc_scores": doc_scores, "loss": loss}


if __name__ == "__main__":
    params = init_params()

    key = jax.random.PRNGKey(0)
    k1, k2 = jax.random.split(key)
    input_ids = jax.random.randint(k1, (B, S), 0, ENC_VOCAB, dtype=jnp.int32)
    labels = jax.random.randint(k2, (B, T), 0, V, dtype=jnp.int32)
    attention_mask = jnp.ones((B, S), dtype=jnp.int32)
    decoder_attention_mask = jnp.ones((B, T), dtype=jnp.int32)

    fwd = jax.jit(functools.partial(rag_forward, params))
    out = fwd(input_ids, labels, attention_mask, decoder_attention_mask)
    jax.block_until_ready(out)

    assert out["logits"].shape == (B * N_DOCS, T, V)
    assert out["doc_scores"].shape == (B, N_DOCS)
    assert bool(jnp.isfinite(out["loss"]))
    print("KERNEL_OK")
</pallas_src>

<mosaic_0001>
module attributes {stable_mosaic.version = 11 : i64} {
  func.func @_encoder_pool_kernel(%arg0: memref<2x8x32xf32, #tpu.memory_space<vmem>>, %arg1: memref<2x8x1xf32, #tpu.memory_space<vmem>>, %arg2: memref<32x128xbf16, #tpu.memory_space<vmem>>, %arg3: memref<2x128xf32, #tpu.memory_space<vmem>>) attributes {dimension_semantics = [], scalar_prefetch = 0 : i64, scratch_operands = 0 : i64, tpu.core_type = #tpu.core_type<tc>} {
    %c0 = arith.constant 0 : index
    %c0_0 = arith.constant 0 : index
    %c0_1 = arith.constant 0 : index
    %0 = vector.load %arg0[%c0, %c0_0, %c0_1] : memref<2x8x32xf32, #tpu.memory_space<vmem>>, vector<2x8x32xf32>
    %c0_2 = arith.constant 0 : index
    %c0_3 = arith.constant 0 : index
    %c0_4 = arith.constant 0 : index
    %1 = vector.load %arg1[%c0_2, %c0_3, %c0_4] : memref<2x8x1xf32, #tpu.memory_space<vmem>>, vector<2x8x1xf32>
    %2 = vector.broadcast %1 : vector<2x8x1xf32> to vector<2x8x32xf32>
    %3 = arith.mulf %0, %2 : vector<2x8x32xf32>
    %4 = vector.shape_cast %3 : vector<2x8x32xf32> to vector<16x32xf32>
    %5 = arith.truncf %4 : vector<16x32xf32> to vector<16x32xbf16>
    %c0_5 = arith.constant 0 : index
    %c0_6 = arith.constant 0 : index
    %6 = vector.load %arg2[%c0_5, %c0_6] : memref<32x128xbf16, #tpu.memory_space<vmem>>, vector<32x128xbf16>
    %cst = arith.constant dense<0.000000e+00> : vector<16x128xf32>
    %7 = tpu.matmul %5, %6, %cst {dimension_numbers = #tpu.dot_dimension_numbers<[1], [0], [0], [1], [0, 0, 1, 1], [], []>} : vector<16x32xbf16>, vector<32x128xbf16>, vector<16x128xf32> -> vector<16x128xf32>
    %8 = math.tanh %7 : vector<16x128xf32>
    %9 = vector.shape_cast %8 : vector<16x128xf32> to vector<2x8x128xf32>
    %cst_7 = arith.constant dense<0.000000e+00> : vector<2x128xf32>
    %10 = vector.multi_reduction <add>, %9, %cst_7 [1] : vector<2x8x128xf32> to vector<2x128xf32>
    %cst_8 = arith.constant 8.000000e+00 : f32
    %11 = vector.broadcast %cst_8 : f32 to vector<2x128xf32>
    %12 = arith.divf %10, %11 : vector<2x128xf32>
    %c0_9 = arith.constant 0 : index
    %c0_10 = arith.constant 0 : index
    %13 = vector.load %arg3[%c0_9, %c0_10] : memref<2x128xf32, #tpu.memory_space<vmem>>, vector<2x128xf32>
    tpu.vector_store %arg3[%c0_9, %c0_10], %12 {strides = array<i32>} : memref<2x128xf32, #tpu.memory_space<vmem>>, vector<2x128xf32>,
    return
  }
}

module attributes {stable_mosaic.version = 11 : i64} {
  func.func @_rag_post_kernel(%arg0: memref<2x32xf32, #tpu.memory_space<vmem>>, %arg1: memref<2x4x32xf32, #tpu.memory_space<vmem>>, %arg2: memref<2x8x32xf32, #tpu.memory_space<vmem>>, %arg3: memref<2x8x1xf32, #tpu.memory_space<vmem>>, %arg4: memref<32x32xbf16, #tpu.memory_space<vmem>>, %arg5: memref<32x128xbf16, #tpu.memory_space<vmem>>, %arg6: memref<64x1xi32, #tpu.memory_space<vmem>>, %arg7: memref<64x128xf32, #tpu.memory_space<vmem>>, %arg8: memref<2x128xf32, #tpu.memory_space<vmem>>, %arg9: memref<1x128xf32, #tpu.memory_space<vmem>>) attributes {dimension_semantics = [], scalar_prefetch = 0 : i64, scratch_operands = 0 : i64, tpu.core_type = #tpu.core_type<tc>} {
    %c0 = arith.constant 0 : index
    %c0_0 = arith.constant 0 : index
    %0 = vector.load %arg0[%c0, %c0_0] : memref<2x32xf32, #tpu.memory_space<vmem>>, vector<2x32xf32>
    %c0_1 = arith.constant 0 : index
    %c0_2 = arith.constant 0 : index
    %c0_3 = arith.constant 0 : index
    %1 = vector.load %arg1[%c0_1, %c0_2, %c0_3] : memref<2x4x32xf32, #tpu.memory_space<vmem>>, vector<2x4x32xf32>
    %2 = vector.shape_cast %0 : vector<2x32xf32> to vector<2x1x32xf32>
    %3 = vector.broadcast %2 : vector<2x1x32xf32> to vector<2x4x32xf32>
    %4 = arith.mulf %3, %1 : vector<2x4x32xf32>
    %cst = arith.constant dense<0.000000e+00> : vector<2x4xf32>
    %5 = vector.multi_reduction <add>, %4, %cst [2] : vector<2x4x32xf32> to vector<2x4xf32>
    %6 = tpu.iota {dimensions = array<i32: 0>} : vector<4x128xi32>
    %7 = tpu.iota {dimensions = array<i32: 1>} : vector<4x128xi32>
    %8 = arith.cmpi eq, %6, %7 : vector<4x128xi32>
    %9 = arith.extui %8 : vector<4x128xi1> to vector<4x128xi32>
    %10 = arith.sitofp %9 : vector<4x128xi32> to vector<4x128xf32>
    %cst_4 = arith.constant dense<0.000000e+00> : vector<2x128xf32>
    %11 = tpu.matmul %5, %10, %cst_4 {dimension_numbers = #tpu.dot_dimension_numbers<[1], [0], [0], [1], [0, 0, 1, 1], [], []>} : vector<2x4xf32>, vector<4x128xf32>, vector<2x128xf32> -> vector<2x128xf32>
    %c0_5 = arith.constant 0 : index
    %c0_6 = arith.constant 0 : index
    %12 = vector.load %arg8[%c0_5, %c0_6] : memref<2x128xf32, #tpu.memory_space<vmem>>, vector<2x128xf32>
    tpu.vector_store %arg8[%c0_5, %c0_6], %11 {strides = array<i32>} : memref<2x128xf32, #tpu.memory_space<vmem>>, vector<2x128xf32>,
    %13 = vector.shape_cast %1 : vector<2x4x32xf32> to vector<8x32xf32>
    %14 = arith.truncf %13 : vector<8x32xf32> to vector<8x32xbf16>
    %c0_7 = arith.constant 0 : index
    %c0_8 = arith.constant 0 : index
    %15 = vector.load %arg4[%c0_7, %c0_8] : memref<32x32xbf16, #tpu.memory_space<vmem>>, vector<32x32xbf16>
    %cst_9 = arith.constant dense<0.000000e+00> : vector<8x32xf32>
    %16 = tpu.matmul %14, %15, %cst_9 {dimension_numbers = #tpu.dot_dimension_numbers<[1], [0], [0], [1], [0, 0, 1, 1], [], []>} : vector<8x32xbf16>, vector<32x32xbf16>, vector<8x32xf32> -> vector<8x32xf32>
    %c0_10 = arith.constant 0 : index
    %c0_11 = arith.constant 0 : index
    %c0_12 = arith.constant 0 : index
    %17 = vector.load %arg2[%c0_10, %c0_11, %c0_12] : memref<2x8x32xf32, #tpu.memory_space<vmem>>, vector<2x8x32xf32>
    %c0_13 = arith.constant 0 : index
    %c0_14 = arith.constant 0 : index
    %c0_15 = arith.constant 0 : index
    %18 = vector.load %arg3[%c0_13, %c0_14, %c0_15] : memref<2x8x1xf32, #tpu.memory_space<vmem>>, vector<2x8x1xf32>
    %19 = vector.broadcast %18 : vector<2x8x1xf32> to vector<2x8x32xf32>
    %20 = arith.mulf %17, %19 : vector<2x8x32xf32>
    %21 = vector.extract_strided_slice %20 {offsets = [0, 0, 0], sizes = [1, 8, 32], strides = [1, 1, 1]} : vector<2x8x32xf32> to vector<1x8x32xf32>
    %22 = vector.shape_cast %21 : vector<1x8x32xf32> to vector<8x32xf32>
    %23 = vector.extract_strided_slice %16 {offsets = [0, 0], sizes = [1, 32], strides = [1, 1]} : vector<8x32xf32> to vector<1x32xf32>
    %24 = vector.broadcast %23 : vector<1x32xf32> to vector<8x32xf32>
    %25 = arith.addf %22, %24 : vector<8x32xf32>
    %26 = math.tanh %25 : vector<8x32xf32>
    %27 = vector.extract_strided_slice %20 {offsets = [0, 0, 0], sizes = [1, 8, 32], strides = [1, 1, 1]} : vector<2x8x32xf32> to vector<1x8x32xf32>
    %28 = vector.shape_cast %27 : vector<1x8x32xf32> to vector<8x32xf32>
    %29 = vector.extract_strided_slice %16 {offsets = [1, 0], sizes = [1, 32], strides = [1, 1]} : vector<8x32xf32> to vector<1x32xf32>
    %30 = vector.broadcast %29 : vector<1x32xf32> to vector<8x32xf32>
    %31 = arith.addf %28, %30 : vector<8x32xf32>
    %32 = math.tanh %31 : vector<8x32xf32>
    %33 = vector.extract_strided_slice %20 {offsets = [0, 0, 0], sizes = [1, 8, 32], strides = [1, 1, 1]} : vector<2x8x32xf32> to vector<1x8x32xf32>
    %34 = vector.shape_cast %33 : vector<1x8x32xf32> to vector<8x32xf32>
    %35 = vector.extract_strided_slice %16 {offsets = [2, 0], sizes = [1, 32], strides = [1, 1]} : vector<8x32xf32> to vector<1x32xf32>
    %36 = vector.broadcast %35 : vector<1x32xf32> to vector<8x32xf32>
    %37 = arith.addf %34, %36 : vector<8x32xf32>
    %38 = math.tanh %37 : vector<8x32xf32>
    %39 = vector.extract_strided_slice %20 {offsets = [0, 0, 0], sizes = [1, 8, 32], strides = [1, 1, 1]} : vector<2x8x32xf32> to vector<1x8x32xf32>
    %40 = vector.shape_cast %39 : vector<1x8x32xf32> to vector<8x32xf32>
    %41 = vector.extract_strided_slice %16 {offsets = [3, 0], sizes = [1, 32], strides = [1, 1]} : vector<8x32xf32> to vector<1x32xf32>
    %42 = vector.broadcast %41 : vector<1x32xf32> to vector<8x32xf32>
    %43 = arith.addf %40, %42 : vector<8x32xf32>
    %44 = math.tanh %43 : vector<8x32xf32>
    %45 = vector.extract_strided_slice %20 {offsets = [1, 0, 0], sizes = [1, 8, 32], strides = [1, 1, 1]} : vector<2x8x32xf32> to vector<1x8x32xf32>
    %46 = vector.shape_cast %45 : vector<1x8x32xf32> to vector<8x32xf32>
    %47 = vector.extract_strided_slice %16 {offsets = [4, 0], sizes = [1, 32], strides = [1, 1]} : vector<8x32xf32> to vector<1x32xf32>
    %48 = vector.broadcast %47 : vector<1x32xf32> to vector<8x32xf32>
    %49 = arith.addf %46, %48 : vector<8x32xf32>
    %50 = math.tanh %49 : vector<8x32xf32>
    %51 = vector.extract_strided_slice %20 {offsets = [1, 0, 0], sizes = [1, 8, 32], strides = [1, 1, 1]} : vector<2x8x32xf32> to vector<1x8x32xf32>
    %52 = vector.shape_cast %51 : vector<1x8x32xf32> to vector<8x32xf32>
    %53 = vector.extract_strided_slice %16 {offsets = [5, 0], sizes = [1, 32], strides = [1, 1]} : vector<8x32xf32> to vector<1x32xf32>
    %54 = vector.broadcast %53 : vector<1x32xf32> to vector<8x32xf32>
    %55 = arith.addf %52, %54 : vector<8x32xf32>
    %56 = math.tanh %55 : vector<8x32xf32>
    %57 = vector.extract_strided_slice %20 {offsets = [1, 0, 0], sizes = [1, 8, 32], strides = [1, 1, 1]} : vector<2x8x32xf32> to vector<1x8x32xf32>
    %58 = vector.shape_cast %57 : vector<1x8x32xf32> to vector<8x32xf32>
    %59 = vector.extract_strided_slice %16 {offsets = [6, 0], sizes = [1, 32], strides = [1, 1]} : vector<8x32xf32> to vector<1x32xf32>
    %60 = vector.broadcast %59 : vector<1x32xf32> to vector<8x32xf32>
    %61 = arith.addf %58, %60 : vector<8x32xf32>
    %62 = math.tanh %61 : vector<8x32xf32>
    %63 = vector.extract_strided_slice %20 {offsets = [1, 0, 0], sizes = [1, 8, 32], strides = [1, 1, 1]} : vector<2x8x32xf32> to vector<1x8x32xf32>
    %64 = vector.shape_cast %63 : vector<1x8x32xf32> to vector<8x32xf32>
    %65 = vector.extract_strided_slice %16 {offsets = [7, 0], sizes = [1, 32], strides = [1, 1]} : vector<8x32xf32> to vector<1x32xf32>
    %66 = vector.broadcast %65 : vector<1x32xf32> to vector<8x32xf32>
    %67 = arith.addf %64, %66 : vector<8x32xf32>
    %68 = math.tanh %67 : vector<8x32xf32>
    %69 = tpu.concatenate %26, %32, %38, %44, %50, %56, %62, %68 in 0 : vector<8x32xf32>, vector<8x32xf32>, vector<8x32xf32>, vector<8x32xf32>, vector<8x32xf32>, vector<8x32xf32>, vector<8x32xf32>, vector<8x32xf32> -> vector<64x32xf32>
    %70 = arith.truncf %69 : vector<64x32xf32> to vector<64x32xbf16>
    %c0_16 = arith.constant 0 : index
    %c0_17 = arith.constant 0 : index
    %71 = vector.load %arg5[%c0_16, %c0_17] : memref<32x128xbf16, #tpu.memory_space<vmem>>, vector<32x128xbf16>
    %cst_18 = arith.constant dense<0.000000e+00> : vector<64x128xf32>
    %72 = tpu.matmul %70, %71, %cst_18 {dimension_numbers = #tpu.dot_dimension_numbers<[1], [0], [0], [1], [0, 0, 1, 1], [], []>} : vector<64x32xbf16>, vector<32x128xbf16>, vector<64x128xf32> -> vector<64x128xf32>
    %c0_19 = arith.constant 0 : index
    %c0_20 = arith.constant 0 : index
    %73 = vector.load %arg7[%c0_19, %c0_20] : memref<64x128xf32, #tpu.memory_space<vmem>>, vector<64x128xf32>
    tpu.vector_store %arg7[%c0_19, %c0_20], %72 {strides = array<i32>} : memref<64x128xf32, #tpu.memory_space<vmem>>, vector<64x128xf32>,
    %c0_21 = arith.constant 0 : index
    %c0_22 = arith.constant 0 : index
    %74 = vector.load %arg6[%c0_21, %c0_22] : memref<64x1xi32, #tpu.memory_space<vmem>>, vector<64x1xi32>
    %cst_23 = arith.constant dense<0xFF800000> : vector<64xf32>
    %75 = vector.multi_reduction <maximumf>, %72, %cst_23 [1] : vector<64x128xf32> to vector<64xf32>
    %76 = vector.shape_cast %75 : vector<64xf32> to vector<64x1xf32>
    %77 = vector.broadcast %76 : vector<64x1xf32> to vector<64x128xf32>
    %78 = arith.subf %72, %77 : vector<64x128xf32>
    %79 = math.exp %78 : vector<64x128xf32>
    %cst_24 = arith.constant dense<0.000000e+00> : vector<64xf32>
    %80 = vector.multi_reduction <add>, %79, %cst_24 [1] : vector<64x128xf32> to vector<64xf32>
    %81 = vector.shape_cast %80 : vector<64xf32> to vector<64x1xf32>
    %82 = math.log %81 : vector<64x1xf32>
    %83 = arith.addf %76, %82 : vector<64x1xf32>
    %84 = tpu.iota {dimensions = array<i32: 1>} : vector<64x128xi32>
    %85 = vector.broadcast %74 : vector<64x1xi32> to vector<64x128xi32>
    %86 = arith.cmpi eq, %84, %85 : vector<64x128xi32>
    %cst_25 = arith.constant 0.000000e+00 : f32
    %87 = vector.broadcast %cst_25 : f32 to vector<64x128xf32>
    %88 = arith.select %86, %72, %87 : vector<64x128xi1>, vector<64x128xf32>
    %cst_26 = arith.constant dense<0.000000e+00> : vector<64xf32>
    %89 = vector.multi_reduction <add>, %88, %cst_26 [1] : vector<64x128xf32> to vector<64xf32>
    %90 = vector.shape_cast %89 : vector<64xf32> to vector<64x1xf32>
    %91 = arith.subf %83, %90 : vector<64x1xf32>
    %cst_27 = arith.constant dense<0.000000e+00> : vector<1xf32>
    %92 = vector.multi_reduction <add>, %91, %cst_27 [0] : vector<64x1xf32> to vector<1xf32>
    %93 = vector.shape_cast %92 : vector<1xf32> to vector<1x1xf32>
    %cst_28 = arith.constant 1.562500e-02 : f32
    %94 = vector.broadcast %cst_28 : f32 to vector<1x1xf32>
    %95 = arith.mulf %93, %94 : vector<1x1xf32>
    %96 = vector.shape_cast %95 : vector<1x1xf32> to vector<1x1xf32>
    %97 = vector.broadcast %96 : vector<1x1xf32> to vector<1x128xf32>
    %c0_29 = arith.constant 0 : index
    %c0_30 = arith.constant 0 : index
    %98 = vector.load %arg9[%c0_29, %c0_30] : memref<1x128xf32, #tpu.memory_space<vmem>>, vector<1x128xf32>
    tpu.vector_store %arg9[%c0_29, %c0_30], %97 {strides = array<i32>} : memref<1x128xf32, #tpu.memory_space<vmem>>, vector<1x128xf32>,
    return
  }
}

</mosaic_0001>

<bundles_post_ra>
// kernel: rag_forward.2
= control target key start
LH: loop header
LB: loop body
LE: loop exit
PB: predicated region body
PF: predicated region fallthrough
CT: control target
= control target key end

     0   :  { %v144_v0 = vmov 0   ;;  %v145_v2 = vmov 0.0   ;;  %vm146_vm0 = vmmov 0   ;;  %vm48_vm1 = vcmask 261120   ;;  %s188_s1 = inlined_call_operand.vmem [shape: f32[2,8,1], index: 1, kind: input, shape index: {}]   ;;  %s189_s2 = inlined_call_operand.vmem [shape: bf16[32,128], index: 2, kind: input, shape index: {}]   ;;  %s190_s0 = inlined_call_operand.vmem [shape: f32[2,8,32], index: 0, kind: input, shape index: {}]   ;;  %s191_s3 = inlined_call_operand.vmem [shape: f32[2,128], index: 3, kind: output, shape index: {}]  }
   0x1   :  { %137 = vset.pattern.permute.xlu0 %v144_v0  ;;  %v17_v1 = vld [vmem:[%s188_s1] sm:$0xff]  ;;  %126 = vmatprep.subr.bf16.mxu0 %v145_v2  ;;  %v138_v3 = vld [vmem:[%s189_s2 + $0x8] sm:$0xff]   ;;  %vm112_vm2 = vcmask 1041409  }
   0x2   :  { %21 = vperm.xlu0 %137, %v17_v1   ;;  %v18_v4 = vld [vmem:[%s188_s1 + $0x8] sm:$0xff]  ;;  %127 = vmatpush3.bf16.msra.mxu0 %v138_v3  ;;  %v139_v5 = vld [vmem:[%s189_s2] sm:$0xff]  }
   0x3   :  { %128 = vmatprep.subr.bf16.mxu0 %v145_v2  ;;  %130 = vmatprep.mubr.msk.bf16.mxu0 %vm146_vm0, %v145_v2  ;;  %v15_v7 = vld [vmem:[%s190_s0] sm:$0xff]  ;;  %v16_v8 = vld [vmem:[%s190_s0 + $0x8] sm:$0xff] }
   0x6   :  { %26 = vperm.xlu0 %137, %v18_v4   ;;  %129 = vmatpush3.bf16.msra.mxu0 %v139_v5 }
  0x7d   :  { %v22_v6 = vpop.permute.xlu0 %21 }
  0x7e   :  { %v29_v10 = vmul.f32 %v22_v6, %v15_v7 }
  0x81   :  { %v27_v9 = vpop.permute.xlu0 %26 }
  0x82   :  { %v30_v11 = vmul.f32 %v27_v9, %v16_v8 }
  0x84   :  { %v31_v12 = vpack.c.bf16 %v30_v11, %v29_v10 }
  0x86   :  { %131 = vmatmul.mubr.msk.bf16.vlgmr.msra.gmra.mxu0 %vm48_vm1, %v31_v12 }
 0x146   :  { %v86_v13 = vpop.f32.mrf.mxu0 }
 0x147   :  { %140 = vtanh.f32 %v86_v13 }
 0x148   :  { %v132_v14 = vpop.f32.mrf.mxu0 }
 0x14a   :  { %v89_v15 = vpop.f32.mrf.mxu0 }
 0x14b   :  { %142 = vtanh.f32 %v89_v15 }
 0x14c   :  { %v133_v16 = vpop.f32.mrf.mxu0 }
 0x154   :  { %v141_v17 = vpop.eup %140 }
 0x155   :  { %v95_v18 = vrot.slane %v141_v17, 4 }
 0x157   :  { %v96_v19 = vadd.f32 %v141_v17, %v95_v18 }
 0x158   :  { %v143_v20 = vpop.eup %142 }
 0x159   :  { %v97_v21 = vrot.slane %v96_v19, 2  ;;  %v101_v22 = vrot.slane %v143_v20, 4 }
 0x15b   :  { %v98_v23 = vadd.f32 %v97_v21, %v96_v19  ;;  %v102_v24 = vadd.f32 %v143_v20, %v101_v22 }
 0x15d   :  { %v99_v25 = vrot.slane %v98_v23, 1  ;;  %v103_v26 = vrot.slane %v102_v24, 2 }
 0x15f   :  { %v104_v27 = vadd.f32 %v103_v26, %v102_v24  ;;  %v100_v28 = vadd.f32 %v99_v25, %v98_v23 }
 0x161   :  { %v105_v29 = vrot.slane %v104_v27, 1  ;;  %v108_v31 = vmul.f32 0.125, %v100_v28 }
 0x163   :  { %v106_v30 = vadd.f32 %v105_v29, %v104_v27 }
 0x165   :  { %v109_v32 = vmul.f32 0.125, %v106_v30 }
 0x167   :  { %v113_v33 = vsel %vm112_vm2, %v109_v32, %v108_v31 }
 0x168   :  { %115 = vst [vmem:[%s191_s3] sm:$0x3] %v113_v33 }

// kernel: rag_forward.3
= control target key start
LH: loop header
LB: loop body
LE: loop exit
PB: predicated region body
PF: predicated region fallthrough
CT: control target
= control target key end

     0   :  { %15 = vsyncpa [#allocation3], 0  ;;  %v47_v0 = vlaneseq  ;;  %v795_v4 = vmov 1966171168   ;;  %s1037_s0 = inlined_call_operand.vmem [shape: f32[2,32], index: 0, kind: input, shape index: {}]   ;;  %s1038_s1 = inlined_call_operand.vmem [shape: f32[2,4,32], index: 1, kind: input, shape index: {}]   ;;  %s1039_s2 = inlined_call_operand.vmem [shape: f32[2,8,32], index: 2, kind: input, shape index: {}]   ;;  %s1040_s3 = inlined_call_operand.vmem [shape: f32[2,8,1], index: 3, kind: input, shape index: {}]   ;;  %s1041_s4 = inlined_call_operand.vmem [shape: bf16[32,32], index: 4, kind: input, shape index: {}]   ;;  %s1042_s5 = inlined_call_operand.vmem [shape: bf16[32,128], index: 5, kind: input, shape index: {}]   ;;  %s1043_s6 = inlined_call_operand.vmem [shape: s32[64,1], index: 6, kind: input, shape index: {}]   ;;  %s1044_s7 = inlined_call_operand.hbm [shape: f32[64,128], index: 7, kind: output, shape index: {0}]   ;;  %s1045_s8 = inlined_call_operand.hbm [shape: f32[2,128], index: 8, kind: output, shape index: {1}]   ;;  %s1046_s9 = inlined_call_operand.hbm [shape: f32[1,128], index: 9, kind: output, shape index: {2}]  }
   0x1   :  { %v618_v1 = vld.sshfl [vmem:[%s1037_s0] sm:$0x11 pattern:$0x75316420]  ;;  %v34_v3 = vld [vmem:[%s1038_s1 + $0x4] sm:$0xf]  ;;  %v45_v5 = vunpack.c.l.s4 %v795_v4 }
   0x2   :  { %v33_v2 = vld [vmem:[%s1038_s1] sm:$0xf]  ;;  %v863_v6 = vshrl.u32 %v47_v0, 7  ;;  %v43_v9 = vcombine.high %v618_v1, %v618_v1 }
   0x3   :  { %v176_v7 = vcombine.low %v33_v2, %v34_v3  ;;  %v46_v8 = vunpack.c.0.s8 %v45_v5 }
   0x4   :  { %16 = vsyncpa [#allocation5], 0  ;;  %v867_v11 = vsub.s32 0, %v863_v6  ;;  %vm70_vm0 = vcmask 257024   ;;  %v871_v20 = vand.u32 127, %v47_v0  ;;  %v796_v21 = vmov 0.0  }
   0x5   :  { %v49_v10 = vsub.s32 %v46_v8, %v863_v6  ;;  %642 = vmatprep.subr.mxu1 %v796_v21  ;;  %vm99_vm2 = vcmask 1043456   ;;  %vm797_vm3 = vmmov 0   ;;  %v241_v23 = vld [vmem:[%s1040_s3] sm:$0xff]  ;;  %v798_v24 = vmov 0   ;;  %v242_v25 = vld [vmem:[%s1040_s3 + $0x8] sm:$0xff]  ;;  %s800_s19 = smov [#allocation2]  }
   0x6   :  { %vm81_vm1 = vcmp.eq.s32.totalorder %v863_v6, %v871_v20  ;;  %644 = vmatprep.mubr.msk.f32.mxu1 %vm797_vm3, %v796_v21  ;;  %676 = vset.pattern.permute.xlu1 %v798_v24  ;;  %v88_v27 = vsub.s32 %v871_v20, %v863_v6  ;;  %vm94_vm4 = vcmask 1041409   ;;  %vm96_vm5 = vcmask 31744   ;;  %v679_v31 = vld [vmem:[%s1041_s4 + $0x8] sm:$0xff]   ;;  %v680_v33 = vld [vmem:[%s1041_s4] sm:$0xff]   ;;  %s580_s20 = sshll.u32 %s800_s19, 4  ;;  %s581_s20 = int_to_ptr.vmem [resolvable:$true] %s580_s20 }
   0x7   :  { %v50_v12 = vrot.slane %v618_v1, %v49_v10  ;;  %v57_v13 = vrot.slane %v43_v9, %v49_v10  ;;  %v619_v22 = vsel %vm81_vm1, 1.0, %v796_v21  ;;  %677 = vset.pattern.permute.xlu0 %v798_v24  ;;  %245 = vperm.xlu1 %676, %v241_v23   ;;  %v178_v34 = vpack.c.bf16 %v176_v7, %v176_v7  ;;  %v681_v35 = vld [vmem:[%s1042_s5 + $0x8] sm:$0xff]   ;;  %v682_v36 = vld [vmem:[%s1042_s5] sm:$0xff]  }
   0x8   :  { %643 = vmatpush3.msk.msra.mxu1 %vm99_vm2, %v619_v22  ;;  %vm195_vm6 = vcmask 261120   ;;  %655 = vmatprep.subr.bf16.mxu0 %v681_v35  ;;  %v239_v40 = vld [vmem:[%s1039_s2] sm:$0xff]  ;;  %v240_v42 = vld [vmem:[%s1039_s2 + $0x8] sm:$0xff]  ;;  %v269_v43 = vsub.s32 2, %v863_v6  ;;  %v275_v44 = vsub.s32 3, %v863_v6  ;;  %v281_v45 = vsub.s32 4, %v863_v6 }
   0x9   :  { %v61_v14 = vrot.slane %v50_v12, %v867_v11  ;;  %v65_v15 = vrot.slane %v57_v13, %v867_v11  ;;  %647 = vmatprep.subr.bf16.mxu1 %v796_v21  ;;  %656 = vmatpush3.bf16.msra.mxu0 %v681_v35  ;;  %v287_v46 = vsub.s32 5, %v863_v6  ;;  %v263_v47 = vsub.s32 1, %v863_v6  ;;  %v408_v35 = vld [vmem:[%s1043_s6] sm:$0xff] }
   0xa   :  { %657 = vmatprep.subr.bf16.mxu0 %v682_v36  ;;  %v293_v54 = vsub.s32 6, %v863_v6  ;;  %v299_v56 = vsub.s32 7, %v863_v6 }
   0xb   :  { %v68_v16 = vmul.f32 %v61_v14, %v33_v2  ;;  %v69_v17 = vmul.f32 %v65_v15, %v34_v3  ;;  %250 = vperm.xlu1 %676, %v242_v25  }
   0xd   :  { %v71_v18 = vsel %vm70_vm0, %v68_v16, 0.0  ;;  %v74_v19 = vsel %vm70_vm0, %v69_v17, 0.0  ;;  %658 = vmatpush3.bf16.msra.mxu0 %v682_v36  ;;  %v415_v36 = vld [vmem:[%s1043_s6 + $0x38] sm:$0xff] }
   0xe   :  { %72 = vadd.xlane.f32.xlu0 %v71_v18 }
  0x12   :  { %75 = vadd.xlane.f32.xlu0 %v74_v19 }
  0x82   :  { %v246_v37 = vpop.permute.xlu1 %245 }
  0x83   :  { %v253_v48 = vmul.f32 %v246_v37, %v239_v40 }
  0x86   :  { %v251_v41 = vpop.permute.xlu1 %250 }
  0x87   :  { %v254_v49 = vmul.f32 %v251_v41, %v240_v42 }
  0x97   :  { %v73_v26 = vpop.xlane.xlu0 %72 }
  0x98   :  { %v89_v29 = vrot.slane %v73_v26, %v88_v27 }
  0x9b   :  { %v76_v28 = vpop.xlane.xlu0 %75 }
  0x9c   :  { %v93_v30 = vrot.slane %v76_v28, %v88_v27 }
  0x9e   :  { %v95_v32 = vsel %vm94_vm4, %v93_v30, %v89_v29  ;;  %v409_v29 = vld [vmem:[%s1043_s6 + $0x8] sm:$0xff]  ;;  %v410_v30 = vld [vmem:[%s1043_s6 + $0x10] sm:$0xff] }
  0x9f   :  { %645 = vmatmul.mubr.msk.f32.vlgmr.msra.gmra.mxu1 %vm96_vm5, %v95_v32  ;;  %v412_v32 = vld [vmem:[%s1043_s6 + $0x20] sm:$0xff] }
  0xa0   :  { %648 = vmatpush3.bf16.msra.mxu1 %v679_v31  ;;  %651 = vmatprep.mubr.msk.bf16.mxu1 %vm797_vm3, %v796_v21  ;;  %v411_v31 = vld [vmem:[%s1043_s6 + $0x18] sm:$0xff] }
  0xa1   :  { %649 = vmatprep.subr.bf16.mxu1 %v796_v21 }
  0xa4   :  { %650 = vmatpush3.bf16.msra.mxu1 %v680_v33  ;;  %v413_v33 = vld [vmem:[%s1043_s6 + $0x28] sm:$0xff] }
  0xa7   :  { %652 = vmatmul.mubr.msk.bf16.vlgmr.msra.gmra.mxu1 %vm195_vm6, %v178_v34  ;;  %v414_v34 = vld [vmem:[%s1043_s6 + $0x30] sm:$0xff]  ;;  %s799_s6 = smov [#allocation4]  }
  0xa8   :  { %s593_s18 = sshll.u32 %s799_s6, 4  ;;  %s594_s18 = int_to_ptr.vmem [resolvable:$true] %s593_s18 }
  0xa9   :  { %s731_s3 = scalar_lea.vmem %s594_s18, 32  ;;  %p736_p1 = scmp.lt.s32.totalorder %s594_s18, %s594_s18 }
  0xaa   :  { %p732_p0 = scmp.ne.s32.totalorder %s594_s18, %s731_s3  ;;  %p737_p2 = scmp.lt.s32.totalorder %s731_s3, %s731_s3 }
  0xac   :  { %p738_p3 = por %p737_p2, %p736_p1 }
  0xae   :  { %p739_p4 = pnand %p738_p3, %p732_p0 }
 0x15f   :  { %v169_v38 = vpop.f32.mrf.mxu1 }
 0x160   :  { %173 = vst [vmem:[#allocation4] sm:$0x3] %v169_v38 }
 0x161   :  { %v646_v39 = vpop.f32.mrf.mxu1 }
 0x167   :  { %v233_v50 = vpop.f32.mrf.mxu1 }
 0x168   :  { %v270_v51 = vrot.slane %v233_v50, %v269_v43  ;;  %v276_v52 = vrot.slane %v233_v50, %v275_v44  ;;  %v282_v53 = vrot.slane %v233_v50, %v281_v45  ;;  %v288_v55 = vrot.slane %v233_v50, %v287_v46 }
 0x169   :  { %v653_v57 = vpop.f32.mrf.mxu1  ;;  %v258_v58 = vrot.slane %v233_v50, %v867_v11  ;;  %v264_v59 = vrot.slane %v233_v50, %v263_v47  ;;  %v294_v2 = vrot.slane %v233_v50, %v293_v54  ;;  %v300_v4 = vrot.slane %v233_v50, %v299_v56 }
 0x16a   :  { %v271_v60 = vadd.f32 %v270_v51, %v253_v48  ;;  %v277_v61 = vadd.f32 %v276_v52, %v253_v48  ;;  %v283_v1 = vadd.f32 %v282_v53, %v254_v49  ;;  %v289_v3 = vadd.f32 %v288_v55, %v254_v49 }
 0x16b   :  { %v236_v62 = vpop.f32.mrf.mxu1  ;;  %v259_v63 = vadd.f32 %v258_v58, %v253_v48  ;;  %v265_v0 = vadd.f32 %v264_v59, %v253_v48  ;;  %v295_v7 = vadd.f32 %v294_v2, %v254_v49  ;;  %v301_v6 = vadd.f32 %v300_v4, %v254_v49 }
 0x16c   :  { %683 = vtanh.f32 %v271_v60 }
 0x16d   :  { %v654_v5 = vpop.f32.mrf.mxu1  ;;  %685 = vtanh.f32 %v259_v63 }
 0x16e   :  { %687 = vtanh.f32 %v265_v0 }
 0x16f   :  { %689 = vtanh.f32 %v277_v61 }
 0x170   :  { %691 = vtanh.f32 %v283_v1 }
 0x171   :  { %693 = vtanh.f32 %v289_v3 }
 0x172   :  { %695 = vtanh.f32 %v295_v7 }
 0x173   :  { %697 = vtanh.f32 %v301_v6 }
 0x179   :  { %v684_v8 = vpop.eup %683 }
 0x17a   :  { %v686_v9 = vpop.eup %685 }
 0x17b   :  { %v688_v10 = vpop.eup %687 }
 0x17c   :  { %v690_v11 = vpop.eup %689  ;;  %v303_v12 = vpack.c.bf16 %v688_v10, %v686_v9 }
 0x17d   :  { %v692_v13 = vpop.eup %691  ;;  %v304_v14 = vpack.c.bf16 %v690_v11, %v684_v8 }
 0x17e   :  { %v694_v15 = vpop.eup %693  ;;  %659 = vmatprep.mubr.msk.bf16.mxu0 %vm195_vm6, %v303_v12 }
 0x17f   :  { %660 = vmatmul.mubr.msk.bf16.vlgmr.msra.gmra.mxu0 %vm195_vm6, %v304_v14  ;;  %v305_v16 = vpack.c.bf16 %v694_v15, %v692_v13  ;;  %v696_v17 = vpop.eup %695 }
 0x180   :  { %v698_v18 = vpop.eup %697 }
 0x181   :  { %663 = vmatprep.mubr.msk.bf16.mxu0 %vm195_vm6, %v305_v16  ;;  %v306_v19 = vpack.c.bf16 %v698_v18, %v696_v17 }
 0x187   :  { %664 = vmatmul.mubr.msk.bf16.gmra.mxu0 %vm195_vm6, %v306_v19 }
 0x23f   :  { %v916_v21 = vpop.f32.mrf.mxu0 }
 0x240   :  { %402 = vst [vmem:[#allocation2 + $0x10] sm:$0xff] %v916_v21  ;;  %420 = vmax.xlane.f32.xlu0 %v916_v21 }
 0x241   :  { %v920_v22 = vpop.f32.mrf.mxu0 }
 0x242   :  { %400 = vst [vmem:[#allocation2] sm:$0xff] %v920_v22 }
 0x243   :  { %v923_v23 = vpop.f32.mrf.mxu0 }
 0x244   :  { %403 = vst [vmem:[#allocation2 + $0x18] sm:$0xff] %v923_v23  ;;  %416 = vmax.xlane.f32.xlu0 %v920_v22 }
 0x245   :  { %v927_v24 = vpop.f32.mrf.mxu0 }
 0x246   :  { %401 = vst [vmem:[#allocation2 + $0x8] sm:$0xff] %v927_v24  ;;  %418 = vmax.xlane.f32.xlu1 %v927_v24 }
 0x247   :  { %v931_v25 = vpop.f32.mrf.mxu0 }
 0x248   :  { %406 = vst [vmem:[#allocation2 + $0x30] sm:$0xff] %v931_v25  ;;  %422 = vmax.xlane.f32.xlu0 %v923_v23 }
 0x249   :  { %v935_v26 = vpop.f32.mrf.mxu0 }
 0x24a   :  { %404 = vst [vmem:[#allocation2 + $0x20] sm:$0xff] %v935_v26 }
 0x24b   :  { %v938_v27 = vpop.f32.mrf.mxu0 }
 0x24c   :  { %407 = vst [vmem:[#allocation2 + $0x38] sm:$0xff] %v938_v27  ;;  %428 = vmax.xlane.f32.xlu0 %v931_v25 }
 0x24d   :  { %v942_v28 = vpop.f32.mrf.mxu0 }
 0x24e   :  { %405 = vst [vmem:[#allocation2 + $0x28] sm:$0xff] %v942_v28 }
 0x250   :  { %424 = vmax.xlane.f32.xlu0 %v935_v26 }
 0x254   :  { %430 = vmax.xlane.f32.xlu0 %v938_v27 }
 0x257   :  { %500 = vperm.xlu1 %676, %v409_v29  }
 0x258   :  { %426 = vmax.xlane.f32.xlu0 %v942_v28 }
 0x25b   :  { %503 = vperm.xlu1 %676, %v410_v30  }
 0x25f   :  { %506 = vperm.xlu1 %676, %v411_v31  }
 0x263   :  { %509 = vperm.xlu1 %676, %v412_v32  }
 0x267   :  { %512 = vperm.xlu1 %676, %v413_v33  }
 0x26b   :  { %515 = vperm.xlu1 %676, %v414_v34  }
 0x26e   :  { %497 = vperm.xlu0 %677, %v408_v35  }
 0x272   :  { %518 = vperm.xlu0 %677, %v415_v36  }
 0x2c9   :  { %v972_v37 = vpop.xlane.xlu0 %420 }
 0x2ca   :  { %v434_v41 = vsub.f32 %v916_v21, %v972_v37 }
 0x2cc   :  { %v444_v47 = vmul.f32 1.442695, %v434_v41 }
 0x2cd   :  { %v974_v38 = vpop.xlane.xlu0 %416 }
 0x2ce   :  { %v432_v39 = vsub.f32 %v920_v22, %v974_v38 }
 0x2cf   :  { %v978_v40 = vpop.xlane.xlu1 %418 }
 0x2d0   :  { %v440_v42 = vmul.f32 1.442695, %v432_v39  ;;  %v433_v43 = vsub.f32 %v927_v24, %v978_v40 }
 0x2d1   :  { %v984_v44 = vpop.xlane.xlu0 %422 }
 0x2d2   :  { %699 = vpow2.f32 %v440_v42  ;;  %v442_v45 = vmul.f32 1.442695, %v433_v43  ;;  %v435_v46 = vsub.f32 %v923_v23, %v984_v44 }
 0x2d3   :  { %v501_v53 = vpop.permute.xlu1 %500 }
 0x2d4   :  { %701 = vpow2.f32 %v442_v45  ;;  %v446_v48 = vmul.f32 1.442695, %v435_v46  ;;  %vm521_vm9 = vcmp.eq.s32.totalorder %v871_v20, %v501_v53 }
 0x2d5   :  { %v988_v49 = vpop.xlane.xlu0 %428  ;;  %v529_v14 = vsel %vm521_vm9, %v927_v24, 0.0 }
 0x2d6   :  { %703 = vpow2.f32 %v446_v48  ;;  %v438_v51 = vsub.f32 %v931_v25, %v988_v49 }
 0x2d7   :  { %705 = vpow2.f32 %v444_v47  ;;  %v504_v59 = vpop.permute.xlu1 %503 }
 0x2d8   :  { %v452_v56 = vmul.f32 1.442695, %v438_v51  ;;  %vm522_vm8 = vcmp.eq.s32.totalorder %v871_v20, %v504_v59 }
 0x2d9   :  { %v990_v50 = vpop.xlane.xlu0 %424  ;;  %v530_v12 = vsel %vm522_vm8, %v916_v21, 0.0 }
 0x2da   :  { %v436_v52 = vsub.f32 %v935_v26, %v990_v50 }
 0x2db   :  { %v507_v3 = vpop.permute.xlu1 %506 }
 0x2dc   :  { %v448_v54 = vmul.f32 1.442695, %v436_v52  ;;  %vm523_vm11 = vcmp.eq.s32.totalorder %v871_v20, %v507_v3 }
 0x2dd   :  { %v996_v55 = vpop.xlane.xlu0 %430  ;;  %v531_v16 = vsel %vm523_vm11, %v923_v23, 0.0 }
 0x2de   :  { %707 = vpow2.f32 %v448_v54  ;;  %v439_v61 = vsub.f32 %v938_v27, %v996_v55 }
 0x2df   :  { %v700_v57 = vpop.eup %699  ;;  %709 = vpow2.f32 %v452_v56  ;;  %v510_v5 = vpop.permute.xlu1 %509 }
 0x2e0   :  { %456 = vadd.xlane.f32.xlu1 %v700_v57  ;;  %v454_v2 = vmul.f32 1.442695, %v439_v61  ;;  %vm524_vm10 = vcmp.eq.s32.totalorder %v871_v20, %v510_v5 }
 0x2e1   :  { %v702_v58 = vpop.eup %701  ;;  %v998_v60 = vpop.xlane.xlu0 %426  ;;  %v532_v15 = vsel %vm524_vm10, %v935_v26, 0.0 }
 0x2e2   :  { %v437_v62 = vsub.f32 %v942_v28, %v998_v60  ;;  %458 = vadd.xlane.f32.xlu0 %v702_v58 }
 0x2e3   :  { %v704_v63 = vpop.eup %703  ;;  %v513_v9 = vpop.permute.xlu1 %512 }
 0x2e4   :  { %v450_v0 = vmul.f32 1.442695, %v437_v62  ;;  %462 = vadd.xlane.f32.xlu1 %v704_v63  ;;  %v706_v1 = vpop.eup %705  ;;  %vm525_vm13 = vcmp.eq.s32.totalorder %v871_v20, %v513_v9 }
 0x2e5   :  { %v533_v19 = vsel %vm525_vm13, %v942_v28, 0.0 }
 0x2e6   :  { %711 = vpow2.f32 %v450_v0  ;;  %460 = vadd.xlane.f32.xlu0 %v706_v1 }
 0x2e7   :  { %713 = vpow2.f32 %v454_v2  ;;  %v516_v13 = vpop.permute.xlu1 %515 }
 0x2e8   :  { %vm526_vm12 = vcmp.eq.s32.totalorder %v871_v20, %v516_v13 }
 0x2e9   :  { %v498_v7 = vpop.permute.xlu0 %497  ;;  %v534_v17 = vsel %vm526_vm12, %v931_v25, 0.0 }
 0x2ea   :  { %vm520_vm7 = vcmp.eq.s32.totalorder %v871_v20, %v498_v7 }
 0x2eb   :  { %v708_v4 = vpop.eup %707  ;;  %v528_v10 = vsel %vm520_vm7, %v920_v22, 0.0 }
 0x2ec   :  { %464 = vadd.xlane.f32.xlu0 %v708_v4  ;;  %v710_v6 = vpop.eup %709 }
 0x2ed   :  { %v519_v18 = vpop.permute.xlu0 %518 }
 0x2ee   :  { %vm527_vm14 = vcmp.eq.s32.totalorder %v871_v20, %v519_v18 }
 0x2ef   :  { %v535_v21 = vsel %vm527_vm14, %v938_v27, 0.0 }
 0x2f0   :  { %468 = vadd.xlane.f32.xlu0 %v710_v6 }
 0x2f3   :  { %v712_v8 = vpop.eup %711 }
 0x2f4   :  { %466 = vadd.xlane.f32.xlu1 %v712_v8  ;;  %536 = vadd.xlane.f32.xlu0 %v528_v10  ;;  %v714_v11 = vpop.eup %713 }
 0x2f8   :  { %470 = vadd.xlane.f32.xlu1 %v714_v11  ;;  %540 = vadd.xlane.f32.xlu0 %v530_v12 }
 0x2fc   :  { %538 = vadd.xlane.f32.xlu1 %v529_v14  ;;  %544 = vadd.xlane.f32.xlu0 %v532_v15 }
 0x300   :  { %542 = vadd.xlane.f32.xlu1 %v531_v16  ;;  %548 = vadd.xlane.f32.xlu0 %v534_v17 }
 0x304   :  { %546 = vadd.xlane.f32.xlu1 %v533_v19 }
 0x308   :  { %550 = vadd.xlane.f32.xlu1 %v535_v21 }
 0x309   :  { %742 = shalt.err (!%p739_p4)
}
 0x30a   :  { %596 = dma.vmem_to_hbm [thread:$0]  %s594_s18, 32, %s1045_s8, [#allocation5]  }
 0x30b   :  { %s751_s23 = scalar_lea.vmem %s581_s20, 1024  ;;  %p756_p6 = scmp.lt.s32.totalorder %s581_s20, %s581_s20 }
 0x30c   :  { %p752_p5 = scmp.ne.s32.totalorder %s581_s20, %s751_s23  ;;  %p757_p7 = scmp.lt.s32.totalorder %s751_s23, %s751_s23 }
 0x30e   :  { %p758_p8 = por %p757_p7, %p756_p6 }
 0x310   :  { %p759_p9 = pnand %p758_p8, %p752_p5 }
 0x312   :  { %762 = shalt.err (!%p759_p9)
}
 0x313   :  { %s801_s4 = smov 128   ;;  %s802_s24 = smov 8  }
 0x314   :  { %586 = dma.vmem_to_hbm [thread:$0]  %s581_s20, 1024, %s1044_s7, [#allocation3], %s801_s4, %s801_s4, %s802_s24  }
 0x315   :  { %s803_s7 = smov [#allocation6]  }
 0x316   :  { %s603_s8 = sshll.u32 %s803_s7, 4  ;;  %s604_s8 = int_to_ptr.vmem [resolvable:$true] %s603_s8 }
 0x317   :  { %s771_s2 = scalar_lea.vmem %s604_s8, 16  ;;  %s775_s5 = scalar_lea.vmem %s604_s8, 32 }
 0x318   :  { %p772_p10 = scmp.ne.s32.totalorder %s604_s8, %s771_s2  ;;  %p776_p11 = scmp.lt.s32.totalorder %s604_s8, %s604_s8 }
 0x319   :  { %p777_p12 = scmp.lt.s32.totalorder %s775_s5, %s771_s2 }
 0x31b   :  { %p778_p13 = por %p777_p12, %p776_p11 }
 0x31d   :  { %p779_p0 = pnand %p778_p13, %p772_p10 }
 0x369   :  { %v457_v20 = vpop.xlane.xlu1 %456 }
 0x36a   :  { %715 = vlog2.f32 %v457_v20 }
 0x36b   :  { %v459_v22 = vpop.xlane.xlu0 %458 }
 0x36c   :  { %717 = vlog2.f32 %v459_v22 }
 0x36d   :  { %v463_v24 = vpop.xlane.xlu1 %462 }
 0x36f   :  { %v461_v23 = vpop.xlane.xlu0 %460 }
 0x370   :  { %719 = vlog2.f32 %v461_v23 }
 0x371   :  { %721 = vlog2.f32 %v463_v24 }
 0x375   :  { %v465_v25 = vpop.xlane.xlu0 %464 }
 0x376   :  { %723 = vlog2.f32 %v465_v25 }
 0x377   :  { %v716_v27 = vpop.eup %715 }
 0x378   :  { %v473_v32 = vmul.f32 0.6931472, %v716_v27 }
 0x379   :  { %v469_v26 = vpop.xlane.xlu0 %468  ;;  %v718_v28 = vpop.eup %717 }
 0x37a   :  { %725 = vlog2.f32 %v469_v26  ;;  %v475_v33 = vmul.f32 0.6931472, %v718_v28  ;;  %v488_v42 = vadd.f32 %v473_v32, %v974_v38 }
 0x37c   :  { %v489_v45 = vadd.f32 %v475_v33, %v978_v40 }
 0x37d   :  { %v720_v29 = vpop.eup %719  ;;  %v467_v30 = vpop.xlane.xlu1 %466 }
 0x37e   :  { %727 = vlog2.f32 %v467_v30  ;;  %v537_v31 = vpop.xlane.xlu0 %536  ;;  %v477_v34 = vmul.f32 0.6931472, %v720_v29  ;;  %v722_v35 = vpop.eup %721 }
 0x37f   :  { %v479_v41 = vmul.f32 0.6931472, %v722_v35  ;;  %v552_v51 = vsub.f32 %v488_v42, %v537_v31 }
 0x380   :  { %v490_v43 = vadd.f32 %v477_v34, %v972_v37 }
 0x381   :  { %v471_v36 = vpop.xlane.xlu1 %470  ;;  %v491_v57 = vadd.f32 %v479_v41, %v984_v44 }
 0x382   :  { %729 = vlog2.f32 %v471_v36  ;;  %v541_v46 = vpop.xlane.xlu0 %540 }
 0x383   :  { %v724_v39 = vpop.eup %723  ;;  %v554_v54 = vsub.f32 %v490_v43, %v541_v46 }
 0x384   :  { %v481_v48 = vmul.f32 0.6931472, %v724_v39 }
 0x385   :  { %v539_v47 = vpop.xlane.xlu1 %538 }
 0x386   :  { %v553_v52 = vsub.f32 %v489_v45, %v539_v47  ;;  %v492_v61 = vadd.f32 %v481_v48, %v990_v50  ;;  %v545_v37 = vpop.xlane.xlu0 %544 }
 0x387   :  { %v726_v53 = vpop.eup %725 }
 0x388   :  { %v560_v56 = vadd.f32 %v553_v52, %v552_v51  ;;  %v485_v59 = vmul.f32 0.6931472, %v726_v53  ;;  %v556_v2 = vsub.f32 %v492_v61, %v545_v37 }
 0x389   :  { %v543_v58 = vpop.xlane.xlu1 %542 }
 0x38a   :  { %v555_v62 = vsub.f32 %v491_v57, %v543_v58  ;;  %v561_v38 = vadd.f32 %v560_v56, %v554_v54  ;;  %v494_v3 = vadd.f32 %v485_v59, %v988_v49  ;;  %v549_v8 = vpop.xlane.xlu0 %548 }
 0x38b   :  { %v728_v63 = vpop.eup %727 }
 0x38c   :  { %v483_v0 = vmul.f32 0.6931472, %v728_v63  ;;  %v562_v40 = vadd.f32 %v561_v38, %v555_v62  ;;  %v558_v9 = vsub.f32 %v494_v3, %v549_v8 }
 0x38d   :  { %v547_v1 = vpop.xlane.xlu1 %546 }
 0x38e   :  { %v493_v4 = vadd.f32 %v483_v0, %v998_v60  ;;  %v563_v6 = vadd.f32 %v562_v40, %v556_v2 }
 0x38f   :  { %v730_v5 = vpop.eup %729 }
 0x390   :  { %v487_v7 = vmul.f32 0.6931472, %v730_v5  ;;  %v557_v44 = vsub.f32 %v493_v4, %v547_v1 }
 0x391   :  { %v551_v11 = vpop.xlane.xlu1 %550 }
 0x392   :  { %v564_v10 = vadd.f32 %v563_v6, %v557_v44  ;;  %v495_v50 = vadd.f32 %v487_v7, %v996_v55 }
 0x394   :  { %v565_v12 = vadd.f32 %v564_v10, %v558_v9  ;;  %v559_v13 = vsub.f32 %v495_v50, %v551_v11 }
 0x396   :  { %v566_v14 = vadd.f32 %v565_v12, %v559_v13 }
 0x398   :  { %v567_v15 = vrot.slane %v566_v14, 4 }
 0x39a   :  { %v568_v16 = vadd.f32 %v567_v15, %v566_v14 }
 0x39c   :  { %v569_v17 = vrot.slane %v568_v16, 2 }
 0x39e   :  { %v570_v18 = vadd.f32 %v569_v17, %v568_v16 }
 0x3a0   :  { %v571_v49 = vrot.slane %v570_v18, 1 }
 0x3a2   :  { %v572_v60 = vadd.f32 %v571_v49, %v570_v18 }
 0x3a4   :  { %v573_v19 = vmul.f32 0.015625, %v572_v60 }
 0x3a6   :  { %574 = vst [vmem:[#allocation6] sm:$0x1] %v573_v19 }
 0x3a7   :  { %782 = shalt.err (!%p779_p0)
}
 0x3a8   :  { %606 = dma.vmem_to_hbm [thread:$0]  %s604_s8, 16, %s1046_s9, [#allocation5]  }
 0x3a9   :  { %791 = dma.done.wait [#allocation3], 1024  }
 0x3aa   :  { %792 = vsyncadd [#allocation3], 4294966272 }
 0x3ab   :  { %793 = dma.done.wait [#allocation5], 48  }
 0x3ac   :  { %794 = vsyncadd [#allocation5], 4294967248 }
 0x3ad   :  { %616 = vsyncpa [#allocation3], 1 }
 0x3ae   :  { %617 = vsyncpa [#allocation5], 1 }

</bundles_post_ra>
